<compile_context>
chip_gen: v5e
topology: v5e:2x2
jax: 0.10.0
libtpu: 0.0.40
codegen_flags: <defaults>
</compile_context>

<pallas_src>
import functools

import jax
import jax.numpy as jnp
from jax.experimental import pallas as pl
from jax.experimental.pallas import tpu as pltpu

_SUPPORTED_ACTS = ("elu", "relu", "lrelu", "selu", "tanh", "sigmoid", "none")


def _conv2d_layer_kernel(x_ref, w_ref, b_ref, o_ref, patch_ref, *,
                         Cin, K, Wp, Lout, activation):
    """One batch element per grid step.

    x_ref:     (Cin, Lsrc)    zero-padded input, spatial flattened row-major
                              (lane-dense, Lsrc a multiple of 128).
    w_ref:     (Cout, taps)   conv weight, tap-major (r = ci*K*K + i*K + j).
    b_ref:     (Cout, 1)      bias column.
    o_ref:     (Cout, Lout)   stride-1 conv result on the padded-width grid;
                              valid pixels live at m = y*Wp + x (x < Wp-K+1).
    patch_ref: (taps, Lout)   f32 scratch — one lane-dense row per conv tap.
    """
    KK = K * K

    # 1) im2col into lane-dense rows.  On the flattened padded grid every tap
    #    is a contiguous lane slice (offset d = i*Wp + j), so each tap costs a
    #    single static slice, shared across all output channels.
    for ci in range(Cin):
        for i in range(K):
            for j in range(K):
                r = ci * KK + i * K + j
                d = i * Wp + j
                patch_ref[r, :] = x_ref[ci, d:d + Lout].astype(jnp.float32)

    # 2) One MXU contraction over all taps and all spatial positions.
    #    (Cout, taps) x (taps, Lout) -> (Cout, Lout); the MXU is otherwise
    #    idle so this frees the VPU/XLU entirely.
    y = jnp.dot(w_ref[...], patch_ref[...], preferred_element_type=jnp.float32)
    y = y + b_ref[...]                                  # bias column broadcast

    # 3) Activation (exp goes to the EUP slot) + single lane-dense store.
    if activation == "elu":
        y = jnp.where(y > 0, y, jnp.exp(y) - 1.0)
    elif activation == "relu":
        y = jnp.maximum(y, 0.0)
    elif activation == "lrelu":
        y = jnp.where(y > 0, y, 0.2 * y)
    elif activation == "selu":
        y = 1.0507009873554805 * jnp.where(
            y > 0, y, 1.6732632423543772 * (jnp.exp(y) - 1.0))
    elif activation == "tanh":
        y = jnp.tanh(y)
    elif activation == "sigmoid":
        y = jax.nn.sigmoid(y)
    # activation == "none": pass through
    o_ref[...] = y.astype(o_ref.dtype)


def conv2d_layer(x, weight, bias, *, stride=1, padding=0, activation="elu"):
    """Conv2dLayer.forward: zero-pad -> conv2d (+bias) -> activation.

    x:      (B, Cin, H, W)
    weight: (Cout, Cin, K, K)   (OIHW, as in nn.Conv2d)
    bias:   (Cout,)
    """
    if activation not in _SUPPORTED_ACTS:
        raise ValueError(f"unsupported activation: {activation}")
    B, Cin, H, W = x.shape
    Cout, Cin_w, K, K_w = weight.shape
    assert Cin_w == Cin and K_w == K
    P, S = padding, stride

    # ---- wrapper-side layout plumbing (zero pad + lane-dense flatten) ----
    xp = jnp.pad(x, ((0, 0), (0, 0), (P, P), (P, P)))        # ZeroPad2d
    Hp, Wp = H + 2 * P, W + 2 * P
    Ho1, Wo1 = Hp - K + 1, Wp - K + 1                        # stride-1 extents
    L = Ho1 * Wp                                             # valid row length
    Lout = pl.cdiv(L, 128) * 128                             # unmasked vst slab
    d_max = (K - 1) * Wp + (K - 1)                           # largest tap offset
    Lsrc = pl.cdiv(d_max + Lout, 128) * 128                  # full-vreg source rows
    xpf = xp.reshape(B, Cin, Hp * Wp).astype(jnp.float32)
    xpf = jnp.pad(xpf, ((0, 0), (0, 0), (0, Lsrc - Hp * Wp)))

    taps = Cin * K * K
    w2 = weight.reshape(Cout, taps).astype(jnp.float32)      # (Cout, taps)
    b_col = bias.reshape(Cout, 1).astype(jnp.float32)

    kernel = functools.partial(_conv2d_layer_kernel, Cin=Cin, K=K, Wp=Wp,
                               Lout=Lout, activation=activation)

    full = pl.pallas_call(
        kernel,
        out_shape=jax.ShapeDtypeStruct((B, Cout, Lout), x.dtype),
        grid=(B,),
        in_specs=[
            pl.BlockSpec((None, Cin, Lsrc), lambda b: (b, 0, 0)),
            pl.BlockSpec((Cout, taps), lambda b: (0, 0)),
            pl.BlockSpec((Cout, 1), lambda b: (0, 0)),
        ],
        out_specs=pl.BlockSpec((None, Cout, Lout), lambda b: (b, 0, 0)),
        scratch_shapes=[
            pltpu.VMEM((taps, Lout), jnp.float32),           # im2col tap rows
        ],
        compiler_params=pltpu.CompilerParams(
            dimension_semantics=("parallel",),               # feed both v7x TCs
        ),
    )(xpf, w2, b_col)

    # Crop: valid stride-S outputs live at m = (y*S)*Wp + (x*S) on the
    # padded-width grid (pure layout plumbing, done once in the wrapper).
    out = full[:, :, :L].reshape(B, Cout, Ho1, Wp)[:, :, ::S, :Wo1:S]
    return out


def _reference(x, weight, bias, *, stride, padding, activation):
    """Pure-JAX reference matching the PyTorch Conv2dLayer forward."""
    y = jax.lax.conv_general_dilated(
        x, weight, window_strides=(stride, stride),
        padding=[(padding, padding), (padding, padding)],
        dimension_numbers=("NCHW", "OIHW", "NCHW"))
    y = y + bias[None, :, None, None]
    if activation == "elu":
        y = jax.nn.elu(y)
    elif activation == "relu":
        y = jax.nn.relu(y)
    elif activation == "lrelu":
        y = jax.nn.leaky_relu(y, 0.2)
    elif activation == "selu":
        y = jax.nn.selu(y)
    elif activation == "tanh":
        y = jnp.tanh(y)
    elif activation == "sigmoid":
        y = jax.nn.sigmoid(y)
    return y


if __name__ == "__main__":
    key = jax.random.PRNGKey(0)
    kx, kw, kb = jax.random.split(key, 3)

    # Small config consistent with Conv2dLayer defaults (zero pad, ELU, no norm).
    B, Cin, H, W = 2, 4, 16, 16
    Cout, K, S, P = 8, 3, 1, 1
    activation = "elu"

    x = jax.random.normal(kx, (B, Cin, H, W), dtype=jnp.float32)
    fan_in = Cin * K * K
    bound = 1.0 / (fan_in ** 0.5)
    weight = jax.random.uniform(kw, (Cout, Cin, K, K), dtype=jnp.float32,
                                minval=-bound, maxval=bound)
    bias = jax.random.uniform(kb, (Cout,), dtype=jnp.float32,
                              minval=-bound, maxval=bound)

    out = conv2d_layer(x, weight, bias, stride=S, padding=P,
                       activation=activation)
    out = jax.block_until_ready(out)

    ref = _reference(x, weight, bias, stride=S, padding=P,
                     activation=activation)
    assert out.shape == ref.shape, (out.shape, ref.shape)
    assert jnp.allclose(out, ref, rtol=1e-5, atol=1e-5), "mismatch vs reference"

    print("KERNEL_OK")
</pallas_src>

<mosaic_0001>
module attributes {stable_mosaic.version = 11 : i64} {
  func.func @_conv2d_layer_kernel(%arg0: i32, %arg1: memref<1x4x512xf32, #tpu.memory_space<vmem>>, %arg2: memref<8x36xf32, #tpu.memory_space<vmem>>, %arg3: memref<8x1xf32, #tpu.memory_space<vmem>>, %arg4: memref<1x8x384xf32, #tpu.memory_space<vmem>>, %arg5: memref<36x384xf32, #tpu.memory_space<vmem>>) attributes {dimension_semantics = [#tpu.dimension_semantics<parallel>], iteration_bounds = array<i64: 2>, scalar_prefetch = 0 : i64, scratch_operands = 1 : i64, tpu.core_type = #tpu.core_type<tc>, window_params = [{transform_indices = @transform_0, window_bounds = array<i64: 1, 4, 512>}, {pipeline_mode = #tpu.pipeline_mode<synchronous>, transform_indices = @transform_1, window_bounds = array<i64: 8, 36>}, {pipeline_mode = #tpu.pipeline_mode<synchronous>, transform_indices = @transform_2, window_bounds = array<i64: 8, 1>}, {transform_indices = @transform_3, window_bounds = array<i64: 1, 8, 384>}]} {
    %c0 = arith.constant 0 : index
    %c0_0 = arith.constant 0 : index
    %c0_1 = arith.constant 0 : index
    %0 = vector.load %arg1[%c0, %c0_0, %c0_1] : memref<1x4x512xf32, #tpu.memory_space<vmem>>, vector<1x1x384xf32>
    %1 = vector.shape_cast %0 : vector<1x1x384xf32> to vector<384xf32>
    %c0_2 = arith.constant 0 : index
    %c0_3 = arith.constant 0 : index
    %2 = vector.load %arg5[%c0_2, %c0_3] : memref<36x384xf32, #tpu.memory_space<vmem>>, vector<1x384xf32>
    %3 = vector.shape_cast %2 : vector<1x384xf32> to vector<384xf32>
    %4 = vector.shape_cast %1 : vector<384xf32> to vector<1x384xf32>
    tpu.vector_store %arg5[%c0_2, %c0_3], %4 {strides = array<i32>} : memref<36x384xf32, #tpu.memory_space<vmem>>, vector<1x384xf32>,
    %c0_4 = arith.constant 0 : index
    %c0_5 = arith.constant 0 : index
    %c1 = arith.constant 1 : index
    %5 = vector.load %arg1[%c0_4, %c0_5, %c1] : memref<1x4x512xf32, #tpu.memory_space<vmem>>, vector<1x1x384xf32>
    %6 = vector.shape_cast %5 : vector<1x1x384xf32> to vector<384xf32>
    %c1_6 = arith.constant 1 : index
    %c0_7 = arith.constant 0 : index
    %7 = vector.load %arg5[%c1_6, %c0_7] : memref<36x384xf32, #tpu.memory_space<vmem>>, vector<1x384xf32>
    %8 = vector.shape_cast %7 : vector<1x384xf32> to vector<384xf32>
    %9 = vector.shape_cast %6 : vector<384xf32> to vector<1x384xf32>
    tpu.vector_store %arg5[%c1_6, %c0_7], %9 {strides = array<i32>} : memref<36x384xf32, #tpu.memory_space<vmem>>, vector<1x384xf32>,
    %c0_8 = arith.constant 0 : index
    %c0_9 = arith.constant 0 : index
    %c2 = arith.constant 2 : index
    %10 = vector.load %arg1[%c0_8, %c0_9, %c2] : memref<1x4x512xf32, #tpu.memory_space<vmem>>, vector<1x1x384xf32>
    %11 = vector.shape_cast %10 : vector<1x1x384xf32> to vector<384xf32>
    %c2_10 = arith.constant 2 : index
    %c0_11 = arith.constant 0 : index
    %12 = vector.load %arg5[%c2_10, %c0_11] : memref<36x384xf32, #tpu.memory_space<vmem>>, vector<1x384xf32>
    %13 = vector.shape_cast %12 : vector<1x384xf32> to vector<384xf32>
    %14 = vector.shape_cast %11 : vector<384xf32> to vector<1x384xf32>
    tpu.vector_store %arg5[%c2_10, %c0_11], %14 {strides = array<i32>} : memref<36x384xf32, #tpu.memory_space<vmem>>, vector<1x384xf32>,
    %c0_12 = arith.constant 0 : index
    %c0_13 = arith.constant 0 : index
    %c18 = arith.constant 18 : index
    %15 = vector.load %arg1[%c0_12, %c0_13, %c18] : memref<1x4x512xf32, #tpu.memory_space<vmem>>, vector<1x1x384xf32>
    %16 = vector.shape_cast %15 : vector<1x1x384xf32> to vector<384xf32>
    %c3 = arith.constant 3 : index
    %c0_14 = arith.constant 0 : index
    %17 = vector.load %arg5[%c3, %c0_14] : memref<36x384xf32, #tpu.memory_space<vmem>>, vector<1x384xf32>
    %18 = vector.shape_cast %17 : vector<1x384xf32> to vector<384xf32>
    %19 = vector.shape_cast %16 : vector<384xf32> to vector<1x384xf32>
    tpu.vector_store %arg5[%c3, %c0_14], %19 {strides = array<i32>} : memref<36x384xf32, #tpu.memory_space<vmem>>, vector<1x384xf32>,
    %c0_15 = arith.constant 0 : index
    %c0_16 = arith.constant 0 : index
    %c19 = arith.constant 19 : index
    %20 = vector.load %arg1[%c0_15, %c0_16, %c19] : memref<1x4x512xf32, #tpu.memory_space<vmem>>, vector<1x1x384xf32>
    %21 = vector.shape_cast %20 : vector<1x1x384xf32> to vector<384xf32>
    %c4 = arith.constant 4 : index
    %c0_17 = arith.constant 0 : index
    %22 = vector.load %arg5[%c4, %c0_17] : memref<36x384xf32, #tpu.memory_space<vmem>>, vector<1x384xf32>
    %23 = vector.shape_cast %22 : vector<1x384xf32> to vector<384xf32>
    %24 = vector.shape_cast %21 : vector<384xf32> to vector<1x384xf32>
    tpu.vector_store %arg5[%c4, %c0_17], %24 {strides = array<i32>} : memref<36x384xf32, #tpu.memory_space<vmem>>, vector<1x384xf32>,
    %c0_18 = arith.constant 0 : index
    %c0_19 = arith.constant 0 : index
    %c20 = arith.constant 20 : index
    %25 = vector.load %arg1[%c0_18, %c0_19, %c20] : memref<1x4x512xf32, #tpu.memory_space<vmem>>, vector<1x1x384xf32>
    %26 = vector.shape_cast %25 : vector<1x1x384xf32> to vector<384xf32>
    %c5 = arith.constant 5 : index
    %c0_20 = arith.constant 0 : index
    %27 = vector.load %arg5[%c5, %c0_20] : memref<36x384xf32, #tpu.memory_space<vmem>>, vector<1x384xf32>
    %28 = vector.shape_cast %27 : vector<1x384xf32> to vector<384xf32>
    %29 = vector.shape_cast %26 : vector<384xf32> to vector<1x384xf32>
    tpu.vector_store %arg5[%c5, %c0_20], %29 {strides = array<i32>} : memref<36x384xf32, #tpu.memory_space<vmem>>, vector<1x384xf32>,
    %c0_21 = arith.constant 0 : index
    %c0_22 = arith.constant 0 : index
    %c36 = arith.constant 36 : index
    %30 = vector.load %arg1[%c0_21, %c0_22, %c36] : memref<1x4x512xf32, #tpu.memory_space<vmem>>, vector<1x1x384xf32>
    %31 = vector.shape_cast %30 : vector<1x1x384xf32> to vector<384xf32>
    %c6 = arith.constant 6 : index
    %c0_23 = arith.constant 0 : index
    %32 = vector.load %arg5[%c6, %c0_23] : memref<36x384xf32, #tpu.memory_space<vmem>>, vector<1x384xf32>
    %33 = vector.shape_cast %32 : vector<1x384xf32> to vector<384xf32>
    %34 = vector.shape_cast %31 : vector<384xf32> to vector<1x384xf32>
    tpu.vector_store %arg5[%c6, %c0_23], %34 {strides = array<i32>} : memref<36x384xf32, #tpu.memory_space<vmem>>, vector<1x384xf32>,
    %c0_24 = arith.constant 0 : index
    %c0_25 = arith.constant 0 : index
    %c37 = arith.constant 37 : index
    %35 = vector.load %arg1[%c0_24, %c0_25, %c37] : memref<1x4x512xf32, #tpu.memory_space<vmem>>, vector<1x1x384xf32>
    %36 = vector.shape_cast %35 : vector<1x1x384xf32> to vector<384xf32>
    %c7 = arith.constant 7 : index
    %c0_26 = arith.constant 0 : index
    %37 = vector.load %arg5[%c7, %c0_26] : memref<36x384xf32, #tpu.memory_space<vmem>>, vector<1x384xf32>
    %38 = vector.shape_cast %37 : vector<1x384xf32> to vector<384xf32>
    %39 = vector.shape_cast %36 : vector<384xf32> to vector<1x384xf32>
    tpu.vector_store %arg5[%c7, %c0_26], %39 {strides = array<i32>} : memref<36x384xf32, #tpu.memory_space<vmem>>, vector<1x384xf32>,
    %c0_27 = arith.constant 0 : index
    %c0_28 = arith.constant 0 : index
    %c38 = arith.constant 38 : index
    %40 = vector.load %arg1[%c0_27, %c0_28, %c38] : memref<1x4x512xf32, #tpu.memory_space<vmem>>, vector<1x1x384xf32>
    %41 = vector.shape_cast %40 : vector<1x1x384xf32> to vector<384xf32>
    %c8 = arith.constant 8 : index
    %c0_29 = arith.constant 0 : index
    %42 = vector.load %arg5[%c8, %c0_29] : memref<36x384xf32, #tpu.memory_space<vmem>>, vector<1x384xf32>
    %43 = vector.shape_cast %42 : vector<1x384xf32> to vector<384xf32>
    %44 = vector.shape_cast %41 : vector<384xf32> to vector<1x384xf32>
    tpu.vector_store %arg5[%c8, %c0_29], %44 {strides = array<i32>} : memref<36x384xf32, #tpu.memory_space<vmem>>, vector<1x384xf32>,
    %c0_30 = arith.constant 0 : index
    %c1_31 = arith.constant 1 : index
    %c0_32 = arith.constant 0 : index
    %45 = vector.load %arg1[%c0_30, %c1_31, %c0_32] : memref<1x4x512xf32, #tpu.memory_space<vmem>>, vector<1x1x384xf32>
    %46 = vector.shape_cast %45 : vector<1x1x384xf32> to vector<384xf32>
    %c9 = arith.constant 9 : index
    %c0_33 = arith.constant 0 : index
    %47 = vector.load %arg5[%c9, %c0_33] : memref<36x384xf32, #tpu.memory_space<vmem>>, vector<1x384xf32>
    %48 = vector.shape_cast %47 : vector<1x384xf32> to vector<384xf32>
    %49 = vector.shape_cast %46 : vector<384xf32> to vector<1x384xf32>
    tpu.vector_store %arg5[%c9, %c0_33], %49 {strides = array<i32>} : memref<36x384xf32, #tpu.memory_space<vmem>>, vector<1x384xf32>,
    %c0_34 = arith.constant 0 : index
    %c1_35 = arith.constant 1 : index
    %c1_36 = arith.constant 1 : index
    %50 = vector.load %arg1[%c0_34, %c1_35, %c1_36] : memref<1x4x512xf32, #tpu.memory_space<vmem>>, vector<1x1x384xf32>
    %51 = vector.shape_cast %50 : vector<1x1x384xf32> to vector<384xf32>
    %c10 = arith.constant 10 : index
    %c0_37 = arith.constant 0 : index
    %52 = vector.load %arg5[%c10, %c0_37] : memref<36x384xf32, #tpu.memory_space<vmem>>, vector<1x384xf32>
    %53 = vector.shape_cast %52 : vector<1x384xf32> to vector<384xf32>
    %54 = vector.shape_cast %51 : vector<384xf32> to vector<1x384xf32>
    tpu.vector_store %arg5[%c10, %c0_37], %54 {strides = array<i32>} : memref<36x384xf32, #tpu.memory_space<vmem>>, vector<1x384xf32>,
    %c0_38 = arith.constant 0 : index
    %c1_39 = arith.constant 1 : index
    %c2_40 = arith.constant 2 : index
    %55 = vector.load %arg1[%c0_38, %c1_39, %c2_40] : memref<1x4x512xf32, #tpu.memory_space<vmem>>, vector<1x1x384xf32>
    %56 = vector.shape_cast %55 : vector<1x1x384xf32> to vector<384xf32>
    %c11 = arith.constant 11 : index
    %c0_41 = arith.constant 0 : index
    %57 = vector.load %arg5[%c11, %c0_41] : memref<36x384xf32, #tpu.memory_space<vmem>>, vector<1x384xf32>
    %58 = vector.shape_cast %57 : vector<1x384xf32> to vector<384xf32>
    %59 = vector.shape_cast %56 : vector<384xf32> to vector<1x384xf32>
    tpu.vector_store %arg5[%c11, %c0_41], %59 {strides = array<i32>} : memref<36x384xf32, #tpu.memory_space<vmem>>, vector<1x384xf32>,
    %c0_42 = arith.constant 0 : index
    %c1_43 = arith.constant 1 : index
    %c18_44 = arith.constant 18 : index
    %60 = vector.load %arg1[%c0_42, %c1_43, %c18_44] : memref<1x4x512xf32, #tpu.memory_space<vmem>>, vector<1x1x384xf32>
    %61 = vector.shape_cast %60 : vector<1x1x384xf32> to vector<384xf32>
    %c12 = arith.constant 12 : index
    %c0_45 = arith.constant 0 : index
    %62 = vector.load %arg5[%c12, %c0_45] : memref<36x384xf32, #tpu.memory_space<vmem>>, vector<1x384xf32>
    %63 = vector.shape_cast %62 : vector<1x384xf32> to vector<384xf32>
    %64 = vector.shape_cast %61 : vector<384xf32> to vector<1x384xf32>
    tpu.vector_store %arg5[%c12, %c0_45], %64 {strides = array<i32>} : memref<36x384xf32, #tpu.memory_space<vmem>>, vector<1x384xf32>,
    %c0_46 = arith.constant 0 : index
    %c1_47 = arith.constant 1 : index
    %c19_48 = arith.constant 19 : index
    %65 = vector.load %arg1[%c0_46, %c1_47, %c19_48] : memref<1x4x512xf32, #tpu.memory_space<vmem>>, vector<1x1x384xf32>
    %66 = vector.shape_cast %65 : vector<1x1x384xf32> to vector<384xf32>
    %c13 = arith.constant 13 : index
    %c0_49 = arith.constant 0 : index
    %67 = vector.load %arg5[%c13, %c0_49] : memref<36x384xf32, #tpu.memory_space<vmem>>, vector<1x384xf32>
    %68 = vector.shape_cast %67 : vector<1x384xf32> to vector<384xf32>
    %69 = vector.shape_cast %66 : vector<384xf32> to vector<1x384xf32>
    tpu.vector_store %arg5[%c13, %c0_49], %69 {strides = array<i32>} : memref<36x384xf32, #tpu.memory_space<vmem>>, vector<1x384xf32>,
    %c0_50 = arith.constant 0 : index
    %c1_51 = arith.constant 1 : index
    %c20_52 = arith.constant 20 : index
    %70 = vector.load %arg1[%c0_50, %c1_51, %c20_52] : memref<1x4x512xf32, #tpu.memory_space<vmem>>, vector<1x1x384xf32>
    %71 = vector.shape_cast %70 : vector<1x1x384xf32> to vector<384xf32>
    %c14 = arith.constant 14 : index
    %c0_53 = arith.constant 0 : index
    %72 = vector.load %arg5[%c14, %c0_53] : memref<36x384xf32, #tpu.memory_space<vmem>>, vector<1x384xf32>
    %73 = vector.shape_cast %72 : vector<1x384xf32> to vector<384xf32>
    %74 = vector.shape_cast %71 : vector<384xf32> to vector<1x384xf32>
    tpu.vector_store %arg5[%c14, %c0_53], %74 {strides = array<i32>} : memref<36x384xf32, #tpu.memory_space<vmem>>, vector<1x384xf32>,
    %c0_54 = arith.constant 0 : index
    %c1_55 = arith.constant 1 : index
    %c36_56 = arith.constant 36 : index
    %75 = vector.load %arg1[%c0_54, %c1_55, %c36_56] : memref<1x4x512xf32, #tpu.memory_space<vmem>>, vector<1x1x384xf32>
    %76 = vector.shape_cast %75 : vector<1x1x384xf32> to vector<384xf32>
    %c15 = arith.constant 15 : index
    %c0_57 = arith.constant 0 : index
    %77 = vector.load %arg5[%c15, %c0_57] : memref<36x384xf32, #tpu.memory_space<vmem>>, vector<1x384xf32>
    %78 = vector.shape_cast %77 : vector<1x384xf32> to vector<384xf32>
    %79 = vector.shape_cast %76 : vector<384xf32> to vector<1x384xf32>
    tpu.vector_store %arg5[%c15, %c0_57], %79 {strides = array<i32>} : memref<36x384xf32, #tpu.memory_space<vmem>>, vector<1x384xf32>,
    %c0_58 = arith.constant 0 : index
    %c1_59 = arith.constant 1 : index
    %c37_60 = arith.constant 37 : index
    %80 = vector.load %arg1[%c0_58, %c1_59, %c37_60] : memref<1x4x512xf32, #tpu.memory_space<vmem>>, vector<1x1x384xf32>
    %81 = vector.shape_cast %80 : vector<1x1x384xf32> to vector<384xf32>
    %c16 = arith.constant 16 : index
    %c0_61 = arith.constant 0 : index
    %82 = vector.load %arg5[%c16, %c0_61] : memref<36x384xf32, #tpu.memory_space<vmem>>, vector<1x384xf32>
    %83 = vector.shape_cast %82 : vector<1x384xf32> to vector<384xf32>
    %84 = vector.shape_cast %81 : vector<384xf32> to vector<1x384xf32>
    tpu.vector_store %arg5[%c16, %c0_61], %84 {strides = array<i32>} : memref<36x384xf32, #tpu.memory_space<vmem>>, vector<1x384xf32>,
    %c0_62 = arith.constant 0 : index
    %c1_63 = arith.constant 1 : index
    %c38_64 = arith.constant 38 : index
    %85 = vector.load %arg1[%c0_62, %c1_63, %c38_64] : memref<1x4x512xf32, #tpu.memory_space<vmem>>, vector<1x1x384xf32>
    %86 = vector.shape_cast %85 : vector<1x1x384xf32> to vector<384xf32>
    %c17 = arith.constant 17 : index
    %c0_65 = arith.constant 0 : index
    %87 = vector.load %arg5[%c17, %c0_65] : memref<36x384xf32, #tpu.memory_space<vmem>>, vector<1x384xf32>
    %88 = vector.shape_cast %87 : vector<1x384xf32> to vector<384xf32>
    %89 = vector.shape_cast %86 : vector<384xf32> to vector<1x384xf32>
    tpu.vector_store %arg5[%c17, %c0_65], %89 {strides = array<i32>} : memref<36x384xf32, #tpu.memory_space<vmem>>, vector<1x384xf32>,
    %c0_66 = arith.constant 0 : index
    %c2_67 = arith.constant 2 : index
    %c0_68 = arith.constant 0 : index
    %90 = vector.load %arg1[%c0_66, %c2_67, %c0_68] : memref<1x4x512xf32, #tpu.memory_space<vmem>>, vector<1x1x384xf32>
    %91 = vector.shape_cast %90 : vector<1x1x384xf32> to vector<384xf32>
    %c18_69 = arith.constant 18 : index
    %c0_70 = arith.constant 0 : index
    %92 = vector.load %arg5[%c18_69, %c0_70] : memref<36x384xf32, #tpu.memory_space<vmem>>, vector<1x384xf32>
    %93 = vector.shape_cast %92 : vector<1x384xf32> to vector<384xf32>
    %94 = vector.shape_cast %91 : vector<384xf32> to vector<1x384xf32>
    tpu.vector_store %arg5[%c18_69, %c0_70], %94 {strides = array<i32>} : memref<36x384xf32, #tpu.memory_space<vmem>>, vector<1x384xf32>,
    %c0_71 = arith.constant 0 : index
    %c2_72 = arith.constant 2 : index
    %c1_73 = arith.constant 1 : index
    %95 = vector.load %arg1[%c0_71, %c2_72, %c1_73] : memref<1x4x512xf32, #tpu.memory_space<vmem>>, vector<1x1x384xf32>
    %96 = vector.shape_cast %95 : vector<1x1x384xf32> to vector<384xf32>
    %c19_74 = arith.constant 19 : index
    %c0_75 = arith.constant 0 : index
    %97 = vector.load %arg5[%c19_74, %c0_75] : memref<36x384xf32, #tpu.memory_space<vmem>>, vector<1x384xf32>
    %98 = vector.shape_cast %97 : vector<1x384xf32> to vector<384xf32>
    %99 = vector.shape_cast %96 : vector<384xf32> to vector<1x384xf32>
    tpu.vector_store %arg5[%c19_74, %c0_75], %99 {strides = array<i32>} : memref<36x384xf32, #tpu.memory_space<vmem>>, vector<1x384xf32>,
    %c0_76 = arith.constant 0 : index
    %c2_77 = arith.constant 2 : index
    %c2_78 = arith.constant 2 : index
    %100 = vector.load %arg1[%c0_76, %c2_77, %c2_78] : memref<1x4x512xf32, #tpu.memory_space<vmem>>, vector<1x1x384xf32>
    %101 = vector.shape_cast %100 : vector<1x1x384xf32> to vector<384xf32>
    %c20_79 = arith.constant 20 : index
    %c0_80 = arith.constant 0 : index
    %102 = vector.load %arg5[%c20_79, %c0_80] : memref<36x384xf32, #tpu.memory_space<vmem>>, vector<1x384xf32>
    %103 = vector.shape_cast %102 : vector<1x384xf32> to vector<384xf32>
    %104 = vector.shape_cast %101 : vector<384xf32> to vector<1x384xf32>
    tpu.vector_store %arg5[%c20_79, %c0_80], %104 {strides = array<i32>} : memref<36x384xf32, #tpu.memory_space<vmem>>, vector<1x384xf32>,
    %c0_81 = arith.constant 0 : index
    %c2_82 = arith.constant 2 : index
    %c18_83 = arith.constant 18 : index
    %105 = vector.load %arg1[%c0_81, %c2_82, %c18_83] : memref<1x4x512xf32, #tpu.memory_space<vmem>>, vector<1x1x384xf32>
    %106 = vector.shape_cast %105 : vector<1x1x384xf32> to vector<384xf32>
    %c21 = arith.constant 21 : index
    %c0_84 = arith.constant 0 : index
    %107 = vector.load %arg5[%c21, %c0_84] : memref<36x384xf32, #tpu.memory_space<vmem>>, vector<1x384xf32>
    %108 = vector.shape_cast %107 : vector<1x384xf32> to vector<384xf32>
    %109 = vector.shape_cast %106 : vector<384xf32> to vector<1x384xf32>
    tpu.vector_store %arg5[%c21, %c0_84], %109 {strides = array<i32>} : memref<36x384xf32, #tpu.memory_space<vmem>>, vector<1x384xf32>,
    %c0_85 = arith.constant 0 : index
    %c2_86 = arith.constant 2 : index
    %c19_87 = arith.constant 19 : index
    %110 = vector.load %arg1[%c0_85, %c2_86, %c19_87] : memref<1x4x512xf32, #tpu.memory_space<vmem>>, vector<1x1x384xf32>
    %111 = vector.shape_cast %110 : vector<1x1x384xf32> to vector<384xf32>
    %c22 = arith.constant 22 : index
    %c0_88 = arith.constant 0 : index
    %112 = vector.load %arg5[%c22, %c0_88] : memref<36x384xf32, #tpu.memory_space<vmem>>, vector<1x384xf32>
    %113 = vector.shape_cast %112 : vector<1x384xf32> to vector<384xf32>
    %114 = vector.shape_cast %111 : vector<384xf32> to vector<1x384xf32>
    tpu.vector_store %arg5[%c22, %c0_88], %114 {strides = array<i32>} : memref<36x384xf32, #tpu.memory_space<vmem>>, vector<1x384xf32>,
    %c0_89 = arith.constant 0 : index
    %c2_90 = arith.constant 2 : index
    %c20_91 = arith.constant 20 : index
    %115 = vector.load %arg1[%c0_89, %c2_90, %c20_91] : memref<1x4x512xf32, #tpu.memory_space<vmem>>, vector<1x1x384xf32>
    %116 = vector.shape_cast %115 : vector<1x1x384xf32> to vector<384xf32>
    %c23 = arith.constant 23 : index
    %c0_92 = arith.constant 0 : index
    %117 = vector.load %arg5[%c23, %c0_92] : memref<36x384xf32, #tpu.memory_space<vmem>>, vector<1x384xf32>
    %118 = vector.shape_cast %117 : vector<1x384xf32> to vector<384xf32>
    %119 = vector.shape_cast %116 : vector<384xf32> to vector<1x384xf32>
    tpu.vector_store %arg5[%c23, %c0_92], %119 {strides = array<i32>} : memref<36x384xf32, #tpu.memory_space<vmem>>, vector<1x384xf32>,
    %c0_93 = arith.constant 0 : index
    %c2_94 = arith.constant 2 : index
    %c36_95 = arith.constant 36 : index
    %120 = vector.load %arg1[%c0_93, %c2_94, %c36_95] : memref<1x4x512xf32, #tpu.memory_space<vmem>>, vector<1x1x384xf32>
    %121 = vector.shape_cast %120 : vector<1x1x384xf32> to vector<384xf32>
    %c24 = arith.constant 24 : index
    %c0_96 = arith.constant 0 : index
    %122 = vector.load %arg5[%c24, %c0_96] : memref<36x384xf32, #tpu.memory_space<vmem>>, vector<1x384xf32>
    %123 = vector.shape_cast %122 : vector<1x384xf32> to vector<384xf32>
    %124 = vector.shape_cast %121 : vector<384xf32> to vector<1x384xf32>
    tpu.vector_store %arg5[%c24, %c0_96], %124 {strides = array<i32>} : memref<36x384xf32, #tpu.memory_space<vmem>>, vector<1x384xf32>,
    %c0_97 = arith.constant 0 : index
    %c2_98 = arith.constant 2 : index
    %c37_99 = arith.constant 37 : index
    %125 = vector.load %arg1[%c0_97, %c2_98, %c37_99] : memref<1x4x512xf32, #tpu.memory_space<vmem>>, vector<1x1x384xf32>
    %126 = vector.shape_cast %125 : vector<1x1x384xf32> to vector<384xf32>
    %c25 = arith.constant 25 : index
    %c0_100 = arith.constant 0 : index
    %127 = vector.load %arg5[%c25, %c0_100] : memref<36x384xf32, #tpu.memory_space<vmem>>, vector<1x384xf32>
    %128 = vector.shape_cast %127 : vector<1x384xf32> to vector<384xf32>
    %129 = vector.shape_cast %126 : vector<384xf32> to vector<1x384xf32>
    tpu.vector_store %arg5[%c25, %c0_100], %129 {strides = array<i32>} : memref<36x384xf32, #tpu.memory_space<vmem>>, vector<1x384xf32>,
    %c0_101 = arith.constant 0 : index
    %c2_102 = arith.constant 2 : index
    %c38_103 = arith.constant 38 : index
    %130 = vector.load %arg1[%c0_101, %c2_102, %c38_103] : memref<1x4x512xf32, #tpu.memory_space<vmem>>, vector<1x1x384xf32>
    %131 = vector.shape_cast %130 : vector<1x1x384xf32> to vector<384xf32>
    %c26 = arith.constant 26 : index
    %c0_104 = arith.constant 0 : index
    %132 = vector.load %arg5[%c26, %c0_104] : memref<36x384xf32, #tpu.memory_space<vmem>>, vector<1x384xf32>
    %133 = vector.shape_cast %132 : vector<1x384xf32> to vector<384xf32>
    %134 = vector.shape_cast %131 : vector<384xf32> to vector<1x384xf32>
    tpu.vector_store %arg5[%c26, %c0_104], %134 {strides = array<i32>} : memref<36x384xf32, #tpu.memory_space<vmem>>, vector<1x384xf32>,
    %c0_105 = arith.constant 0 : index
    %c3_106 = arith.constant 3 : index
    %c0_107 = arith.constant 0 : index
    %135 = vector.load %arg1[%c0_105, %c3_106, %c0_107] : memref<1x4x512xf32, #tpu.memory_space<vmem>>, vector<1x1x384xf32>
    %136 = vector.shape_cast %135 : vector<1x1x384xf32> to vector<384xf32>
    %c27 = arith.constant 27 : index
    %c0_108 = arith.constant 0 : index
    %137 = vector.load %arg5[%c27, %c0_108] : memref<36x384xf32, #tpu.memory_space<vmem>>, vector<1x384xf32>
    %138 = vector.shape_cast %137 : vector<1x384xf32> to vector<384xf32>
    %139 = vector.shape_cast %136 : vector<384xf32> to vector<1x384xf32>
    tpu.vector_store %arg5[%c27, %c0_108], %139 {strides = array<i32>} : memref<36x384xf32, #tpu.memory_space<vmem>>, vector<1x384xf32>,
    %c0_109 = arith.constant 0 : index
    %c3_110 = arith.constant 3 : index
    %c1_111 = arith.constant 1 : index
    %140 = vector.load %arg1[%c0_109, %c3_110, %c1_111] : memref<1x4x512xf32, #tpu.memory_space<vmem>>, vector<1x1x384xf32>
    %141 = vector.shape_cast %140 : vector<1x1x384xf32> to vector<384xf32>
    %c28 = arith.constant 28 : index
    %c0_112 = arith.constant 0 : index
    %142 = vector.load %arg5[%c28, %c0_112] : memref<36x384xf32, #tpu.memory_space<vmem>>, vector<1x384xf32>
    %143 = vector.shape_cast %142 : vector<1x384xf32> to vector<384xf32>
    %144 = vector.shape_cast %141 : vector<384xf32> to vector<1x384xf32>
    tpu.vector_store %arg5[%c28, %c0_112], %144 {strides = array<i32>} : memref<36x384xf32, #tpu.memory_space<vmem>>, vector<1x384xf32>,
    %c0_113 = arith.constant 0 : index
    %c3_114 = arith.constant 3 : index
    %c2_115 = arith.constant 2 : index
    %145 = vector.load %arg1[%c0_113, %c3_114, %c2_115] : memref<1x4x512xf32, #tpu.memory_space<vmem>>, vector<1x1x384xf32>
    %146 = vector.shape_cast %145 : vector<1x1x384xf32> to vector<384xf32>
    %c29 = arith.constant 29 : index
    %c0_116 = arith.constant 0 : index
    %147 = vector.load %arg5[%c29, %c0_116] : memref<36x384xf32, #tpu.memory_space<vmem>>, vector<1x384xf32>
    %148 = vector.shape_cast %147 : vector<1x384xf32> to vector<384xf32>
    %149 = vector.shape_cast %146 : vector<384xf32> to vector<1x384xf32>
    tpu.vector_store %arg5[%c29, %c0_116], %149 {strides = array<i32>} : memref<36x384xf32, #tpu.memory_space<vmem>>, vector<1x384xf32>,
    %c0_117 = arith.constant 0 : index
    %c3_118 = arith.constant 3 : index
    %c18_119 = arith.constant 18 : index
    %150 = vector.load %arg1[%c0_117, %c3_118, %c18_119] : memref<1x4x512xf32, #tpu.memory_space<vmem>>, vector<1x1x384xf32>
    %151 = vector.shape_cast %150 : vector<1x1x384xf32> to vector<384xf32>
    %c30 = arith.constant 30 : index
    %c0_120 = arith.constant 0 : index
    %152 = vector.load %arg5[%c30, %c0_120] : memref<36x384xf32, #tpu.memory_space<vmem>>, vector<1x384xf32>
    %153 = vector.shape_cast %152 : vector<1x384xf32> to vector<384xf32>
    %154 = vector.shape_cast %151 : vector<384xf32> to vector<1x384xf32>
    tpu.vector_store %arg5[%c30, %c0_120], %154 {strides = array<i32>} : memref<36x384xf32, #tpu.memory_space<vmem>>, vector<1x384xf32>,
    %c0_121 = arith.constant 0 : index
    %c3_122 = arith.constant 3 : index
    %c19_123 = arith.constant 19 : index
    %155 = vector.load %arg1[%c0_121, %c3_122, %c19_123] : memref<1x4x512xf32, #tpu.memory_space<vmem>>, vector<1x1x384xf32>
    %156 = vector.shape_cast %155 : vector<1x1x384xf32> to vector<384xf32>
    %c31 = arith.constant 31 : index
    %c0_124 = arith.constant 0 : index
    %157 = vector.load %arg5[%c31, %c0_124] : memref<36x384xf32, #tpu.memory_space<vmem>>, vector<1x384xf32>
    %158 = vector.shape_cast %157 : vector<1x384xf32> to vector<384xf32>
    %159 = vector.shape_cast %156 : vector<384xf32> to vector<1x384xf32>
    tpu.vector_store %arg5[%c31, %c0_124], %159 {strides = array<i32>} : memref<36x384xf32, #tpu.memory_space<vmem>>, vector<1x384xf32>,
    %c0_125 = arith.constant 0 : index
    %c3_126 = arith.constant 3 : index
    %c20_127 = arith.constant 20 : index
    %160 = vector.load %arg1[%c0_125, %c3_126, %c20_127] : memref<1x4x512xf32, #tpu.memory_space<vmem>>, vector<1x1x384xf32>
    %161 = vector.shape_cast %160 : vector<1x1x384xf32> to vector<384xf32>
    %c32 = arith.constant 32 : index
    %c0_128 = arith.constant 0 : index
    %162 = vector.load %arg5[%c32, %c0_128] : memref<36x384xf32, #tpu.memory_space<vmem>>, vector<1x384xf32>
    %163 = vector.shape_cast %162 : vector<1x384xf32> to vector<384xf32>
    %164 = vector.shape_cast %161 : vector<384xf32> to vector<1x384xf32>
    tpu.vector_store %arg5[%c32, %c0_128], %164 {strides = array<i32>} : memref<36x384xf32, #tpu.memory_space<vmem>>, vector<1x384xf32>,
    %c0_129 = arith.constant 0 : index
    %c3_130 = arith.constant 3 : index
    %c36_131 = arith.constant 36 : index
    %165 = vector.load %arg1[%c0_129, %c3_130, %c36_131] : memref<1x4x512xf32, #tpu.memory_space<vmem>>, vector<1x1x384xf32>
    %166 = vector.shape_cast %165 : vector<1x1x384xf32> to vector<384xf32>
    %c33 = arith.constant 33 : index
    %c0_132 = arith.constant 0 : index
    %167 = vector.load %arg5[%c33, %c0_132] : memref<36x384xf32, #tpu.memory_space<vmem>>, vector<1x384xf32>
    %168 = vector.shape_cast %167 : vector<1x384xf32> to vector<384xf32>
    %169 = vector.shape_cast %166 : vector<384xf32> to vector<1x384xf32>
    tpu.vector_store %arg5[%c33, %c0_132], %169 {strides = array<i32>} : memref<36x384xf32, #tpu.memory_space<vmem>>, vector<1x384xf32>,
    %c0_133 = arith.constant 0 : index
    %c3_134 = arith.constant 3 : index
    %c37_135 = arith.constant 37 : index
    %170 = vector.load %arg1[%c0_133, %c3_134, %c37_135] : memref<1x4x512xf32, #tpu.memory_space<vmem>>, vector<1x1x384xf32>
    %171 = vector.shape_cast %170 : vector<1x1x384xf32> to vector<384xf32>
    %c34 = arith.constant 34 : index
    %c0_136 = arith.constant 0 : index
    %172 = vector.load %arg5[%c34, %c0_136] : memref<36x384xf32, #tpu.memory_space<vmem>>, vector<1x384xf32>
    %173 = vector.shape_cast %172 : vector<1x384xf32> to vector<384xf32>
    %174 = vector.shape_cast %171 : vector<384xf32> to vector<1x384xf32>
    tpu.vector_store %arg5[%c34, %c0_136], %174 {strides = array<i32>} : memref<36x384xf32, #tpu.memory_space<vmem>>, vector<1x384xf32>,
    %c0_137 = arith.constant 0 : index
    %c3_138 = arith.constant 3 : index
    %c38_139 = arith.constant 38 : index
    %175 = vector.load %arg1[%c0_137, %c3_138, %c38_139] : memref<1x4x512xf32, #tpu.memory_space<vmem>>, vector<1x1x384xf32>
    %176 = vector.shape_cast %175 : vector<1x1x384xf32> to vector<384xf32>
    %c35 = arith.constant 35 : index
    %c0_140 = arith.constant 0 : index
    %177 = vector.load %arg5[%c35, %c0_140] : memref<36x384xf32, #tpu.memory_space<vmem>>, vector<1x384xf32>
    %178 = vector.shape_cast %177 : vector<1x384xf32> to vector<384xf32>
    %179 = vector.shape_cast %176 : vector<384xf32> to vector<1x384xf32>
    tpu.vector_store %arg5[%c35, %c0_140], %179 {strides = array<i32>} : memref<36x384xf32, #tpu.memory_space<vmem>>, vector<1x384xf32>,
    %c0_141 = arith.constant 0 : index
    %c0_142 = arith.constant 0 : index
    %180 = vector.load %arg2[%c0_141, %c0_142] : memref<8x36xf32, #tpu.memory_space<vmem>>, vector<8x36xf32>
    %c0_143 = arith.constant 0 : index
    %c0_144 = arith.constant 0 : index
    %181 = vector.load %arg5[%c0_143, %c0_144] : memref<36x384xf32, #tpu.memory_space<vmem>>, vector<36x384xf32>
    %cst = arith.constant dense<0.000000e+00> : vector<8x384xf32>
    %182 = tpu.matmul %180, %181, %cst {dimension_numbers = #tpu.dot_dimension_numbers<[1], [0], [0], [1], [0, 0, 1, 1], [], []>} : vector<8x36xf32>, vector<36x384xf32>, vector<8x384xf32> -> vector<8x384xf32>
    %c0_145 = arith.constant 0 : index
    %c0_146 = arith.constant 0 : index
    %183 = vector.load %arg3[%c0_145, %c0_146] : memref<8x1xf32, #tpu.memory_space<vmem>>, vector<8x1xf32>
    %184 = vector.broadcast %183 : vector<8x1xf32> to vector<8x384xf32>
    %185 = arith.addf %182, %184 : vector<8x384xf32>
    %cst_147 = arith.constant 0.000000e+00 : f32
    %186 = vector.broadcast %cst_147 : f32 to vector<8x384xf32>
    %187 = arith.cmpf ogt, %185, %186 : vector<8x384xf32>
    %188 = math.exp %185 : vector<8x384xf32>
    %cst_148 = arith.constant 1.000000e+00 : f32
    %189 = vector.broadcast %cst_148 : f32 to vector<8x384xf32>
    %190 = arith.subf %188, %189 : vector<8x384xf32>
    %191 = arith.select %187, %185, %190 : vector<8x384xi1>, vector<8x384xf32>
    %c0_149 = arith.constant 0 : index
    %c0_150 = arith.constant 0 : index
    %c0_151 = arith.constant 0 : index
    %192 = vector.load %arg4[%c0_149, %c0_150, %c0_151] : memref<1x8x384xf32, #tpu.memory_space<vmem>>, vector<1x8x384xf32>
    %193 = vector.shape_cast %192 : vector<1x8x384xf32> to vector<8x384xf32>
    %194 = vector.shape_cast %191 : vector<8x384xf32> to vector<1x8x384xf32>
    tpu.vector_store %arg4[%c0_149, %c0_150, %c0_151], %194 {strides = array<i32>} : memref<1x8x384xf32, #tpu.memory_space<vmem>>, vector<1x8x384xf32>,
    return
  }
  func.func @transform_0(%arg0: i32) -> (i32, i32, i32) {
    %c0_i32 = arith.constant 0 : i32
    %c0_i32_0 = arith.constant 0 : i32
    %c0_i32_1 = arith.constant 0 : i32
    return %arg0, %c0_i32, %c0_i32_0 : i32, i32, i32
  }
  func.func @transform_1(%arg0: i32) -> (i32, i32) {
    %c0_i32 = arith.constant 0 : i32
    %c0_i32_0 = arith.constant 0 : i32
    %c0_i32_1 = arith.constant 0 : i32
    return %c0_i32, %c0_i32_0 : i32, i32
  }
  func.func @transform_2(%arg0: i32) -> (i32, i32) {
    %c0_i32 = arith.constant 0 : i32
    %c0_i32_0 = arith.constant 0 : i32
    %c0_i32_1 = arith.constant 0 : i32
    return %c0_i32, %c0_i32_0 : i32, i32
  }
  func.func @transform_3(%arg0: i32) -> (i32, i32, i32) {
    %c0_i32 = arith.constant 0 : i32
    %c0_i32_0 = arith.constant 0 : i32
    %c0_i32_1 = arith.constant 0 : i32
    return %arg0, %c0_i32, %c0_i32_0 : i32, i32, i32
  }
}

</mosaic_0001>

<bundles_post_ra>
// kernel: tpu_custom_call.1
= control target key start
LH: loop header
LB: loop body
LE: loop exit
PB: predicated region body
PF: predicated region fallthrough
CT: control target
= control target key end

     0   :  { %8 = vsyncpa [#allocation4], 0  ;;  %s1295_s0 = inlined_call_operand.hbm [shape: f32[2,4,512], index: 0, kind: input, shape index: {}]   ;;  %s1296_s1 = inlined_call_operand.vmem [shape: f32[8,36], index: 1, kind: input, shape index: {}]   ;;  %s1297_s2 = inlined_call_operand.vmem [shape: f32[8,1], index: 2, kind: input, shape index: {}]   ;;  %s1298_s3 = inlined_call_operand.hbm [shape: f32[2,8,384], index: 3, kind: output, shape index: {}]  }
   0x1   :  { %10 = vsyncpa [#allocation4 + $0x1], 0 }
   0x2   :  { %11 = vsyncpa [#allocation5], 0 }
   0x3   :  { %13 = vsyncpa [#allocation5 + $0x1], 0  ;;  %s983_s12 = smov 0   ;;  %s985_s13 = smov 0  }
   0x4   :  { %s987_s14 = smov 0   ;;  %s989_s15 = smov 0  }
   0x5 LB: > { %s1004_s16 = sadd.s32 4294967295, %s952_s15   ;;  %s743_s17 = sadd.s32 4294967294, %s952_s15   ;;  %s952_s15 = sphi %s989_s15, %s1310_s15   ;;  %s948_s14 = sphi %s987_s14, %s1309_s14   ;;  %s944_s13 = sphi %s985_s13, %s1308_s13   ;;  %s940_s12 = sphi %s983_s12, %s1307_s12  }
   0x6   : > { %s1008_s18 = sadd.s32 1, %s952_s15   ;;  %s26_s19 = sadd.s32 1, %s948_s14 }
   0x7   : > { %s23_s20 = ssub.s32 %s952_s15, %s1008_s18  ;;  %p33_p0 = scmp.ne.s32.totalorder %s948_s14, %s944_s13 }
   0x8   : > { %p24_p1 = scmp.eq.s32.totalorder %s23_s20, 0  ;;  %p34_p2 = scmp.eq.s32.totalorder %s952_s15, 0 }
   0x9   : > { %p39_p3 = scmp.ne.s32.totalorder %s944_s13, %s940_s12  ;;  %p40_p4 = scmp.eq.s32.totalorder %s1004_s16, 0 }
   0xa   : > { %s1020_s21 = scalar_select %p24_p1, %s948_s14, %s26_s19  }
   0xb   : > { %p1022_p5 = por %p34_p2, %p33_p0  ;;  %p1026_p6 = por %p40_p4, %p39_p3 }
   0xc   : > { %p105_p7 = scmp.eq.s32.totalorder %s1004_s16, 1  ;;  %p111_p8 = scmp.eq.s32.totalorder %s743_s17, 1 }
   0xd   : > { %p805_p10 = scmp.lt.s32.totalorder %s952_s15, 2  ;;  %s137_s26 = sand.u32 1, %s948_s14  }
   0xe   : > { %p1033_p11 = por %p105_p7, %p33_p0  ;;  %p1037_p12 = por %p111_p8, %p39_p3 }
   0xf   : > { %s790_s27 = sshll.u32 %s952_s15, 4  ;;  %s746_s28 = sshll.u32 %s137_s26, 4 }
  0x10   : > { %s146_s4 = scalar_lea.hbm %s1295_s0, %s790_s27  ;;  %s141_s6 = scalar_lea.vmem [#allocation3], %s746_s28 }
  0x11   : > { %s148_s5 = sshll.u32 %s146_s4, 4  ;;  %s150_s7 = sshll.u32 %s141_s6, 4  ;;  %s149_s5 = int_to_ptr.hbm [resolvable:$true] %s148_s5  ;;  %s151_s7 = int_to_ptr.vmem [resolvable:$true] %s150_s7 }
  0x12   : > { %p1048_p13 = pnand %p805_p10, %p1022_p5  ;;  %p749_p0 = scmp.ge.s32.totalorder %s952_s15, 1 }
  0x13   : > { %p155_p1 = scmp.lt.s32.totalorder %s952_s15, 3  ;;  %s138_s9 = scalar_lea.sflag [#allocation4], %s137_s26 }
  0x14   : > { %s856_s10 = sshra.s32 %s149_s5, 4  ;;  %p860_p3 = pneg %p1048_p13  ;;  %s857_s10 = int_to_ptr.hbm [resolvable:$true] %s856_s10 }
  0x15   : > { %s858_s11 = scalar_lea.hbm %s857_s10, 16  ;;  %s863_s20 = scalar_lea.hbm %s1295_s0, 32 }
  0x16   : > { %p859_p2 = scmp.ne.s32.totalorder %s857_s10, %s858_s11  ;;  %p864_p5 = scmp.lt.s32.totalorder %s857_s10, %s1295_s0 }
  0x17   : > { %p865_p8 = scmp.lt.s32.totalorder %s863_s20, %s858_s11 }
  0x18   : > { %p861_p4 = pnand %p860_p3, %p859_p2 }
  0x19   : > { %p866_p10 = por %p865_p8, %p864_p5 }
  0x1a   : > { %p862_p7 = pneg %p861_p4 }
  0x1c   : > { %p867_p9 = pnand %p866_p10, %p862_p7 }
  0x1e   : > { %870 = shalt.err (!%p867_p9)
}
  0x1f   : > { %800 = dma.hbm_to_vmem [thread:$0]  (!%p1048_p13), %s149_s5, 256, %s151_s7, %s138_s9  }
  0x20   : > { %p156_p2 = pnand %p749_p0, %p155_p1 }
  0x21   : > { %s1069_s26 = sand.u32 (!%p156_p2), 1, %s944_s13  }
  0x22   : > { %159 = sbr.rel (%p156_p2) target bundleno = 399 (0x18f), region = 32  ;;  %s750_s28 = sshll.u32 (!%p156_p2), %s1069_s26, 4 }
  0x23   : > { %s162_s29 = scalar_lea.sflag (!%p156_p2), [#allocation4], %s1069_s26  ;;  %s1073_s30 = scalar_lea.vmem (!%p156_p2), [#allocation3], %s750_s28 }
  0x27   : > { %931 = dma.done.wait (%p1026_p6), %s162_s29, 256  }
  0x28   : > { %933 = vsyncadd (%p1026_p6), %s162_s29, 4294967040  ;;  %v776_v0 = vld [vmem:[%s1073_s30 + $0x3] ss:$4 sm:$0xf]  ;;  %s954_s4 = smov 91   ;;  %s955_s5 = smov 108   ;;  %v190_v32 = vlaneseq }
  0x29   : > { %v774_v1 = vld [vmem:[%s1073_s30 + $0x3] ss:$4 sm:$0xf]  ;;  %524 = vrot.lane.b32.xlu1 %v776_v0, %s954_s4  ;;  %v766_v2 = vld [vmem:[%s1073_s30 + $0x2] ss:$4 sm:$0xf] }
  0x2a   : > { %504 = vrot.lane.b32.xlu0 %v774_v1, %s955_s5  ;;  %s956_s23 = smov 92   ;;  %v777_v3 = vld [vmem:[%s1073_s30 + $0x3] ss:$4 sm:$0xf]  ;;  %s957_s6 = smov 90   ;;  %vm256_vm0 = vcmask 752640  }
  0x2b   : > { %428 = vrot.lane.b32.xlu2 %v766_v2, %s956_s23  ;;  %v775_v4 = vld [vmem:[%s1073_s30 + $0x3] ss:$4 sm:$0xf]  ;;  %v767_v5 = vld [vmem:[%s1073_s30 + $0x2] ss:$4 sm:$0xf] }
  0x2c   : > { %v770_v6 = vld [vmem:[%s1073_s30 + $0x3] ss:$4 sm:$0xf]  ;;  %v768_v7 = vld [vmem:[%s1073_s30 + $0x2] ss:$4 sm:$0xf] }
  0x2d   : > { %s958_s7 = smov 127   ;;  %v771_v8 = vld [vmem:[%s1073_s30 + $0x3] ss:$4 sm:$0xf]  ;;  %s959_s8 = smov 126   ;;  %vm1143_vm1 = vcmp.lt.s32.totalorder %v190_v32, 384 }
  0x2e   : > { %v773_v9 = vld [vmem:[%s1073_s30 + $0x3] ss:$4 sm:$0xf]  ;;  %s960_s9 = smov 109   ;;  %s961_s10 = smov 110   ;;  %vm267_vm2 = vcmask 744448  }
  0x2f   : > { %v772_v10 = vld [vmem:[%s1073_s30 + $0x3] ss:$4 sm:$0xf]  ;;  %v758_v11 = vld [vmem:[%s1073_s30 + $0x1] ss:$4 sm:$0xf] }
  0x30   : > { %v761_v12 = vld [vmem:[%s1073_s30 + $0x2] ss:$4 sm:$0xf]  ;;  %v759_v13 = vld [vmem:[%s1073_s30 + $0x1] ss:$4 sm:$0xf] }
  0x31   : > { %534 = vrot.lane.b32.xlu1 %v777_v3, %s957_s6  ;;  %v762_v14 = vld [vmem:[%s1073_s30 + $0x2] ss:$4 sm:$0xf]  ;;  %v752_v18 = vld [vmem:[%s1073_s30 + $0x1] ss:$4 sm:$0xf] }
  0x32   : > { %514 = vrot.lane.b32.xlu0 %v775_v4, %s956_s23  ;;  %v764_v15 = vld [vmem:[%s1073_s30 + $0x2] ss:$4 sm:$0xf]  ;;  %v273_v19 = vld [vmem:[%s1073_s30] ss:$4 sm:$0xf] }
  0x33   : > { %438 = vrot.lane.b32.xlu2 %v767_v5, %s954_s4  ;;  %v763_v16 = vld [vmem:[%s1073_s30 + $0x2] ss:$4 sm:$0xf]  ;;  %v753_v20 = vld [vmem:[%s1073_s30 + $0x1] ss:$4 sm:$0xf] }
  0x34   : > { %v765_v17 = vld [vmem:[%s1073_s30 + $0x2] ss:$4 sm:$0xf]  ;;  %v755_v21 = vld [vmem:[%s1073_s30 + $0x1] ss:$4 sm:$0xf] }
  0x35   : > { %v754_v22 = vld [vmem:[%s1073_s30 + $0x1] ss:$4 sm:$0xf]  ;;  %v196_v25 = vld [vmem:[%s1073_s30] ss:$4 sm:$0xf] }
  0x36   : > { %v756_v23 = vld [vmem:[%s1073_s30 + $0x1] ss:$4 sm:$0xf]  ;;  %v207_v26 = vld [vmem:[%s1073_s30] ss:$4 sm:$0xf] }
  0x37   : > { %v757_v24 = vld [vmem:[%s1073_s30 + $0x1] ss:$4 sm:$0xf]  ;;  %v218_v27 = vld [vmem:[%s1073_s30] ss:$4 sm:$0xf] }
  0x38   : > { %v229_v28 = vld [vmem:[%s1073_s30] ss:$4 sm:$0xf]  ;;  %vm212_vm3 = vcmask 1031168   ;;  %vm245_vm4 = vcmask 883712   ;;  %vm278_vm5 = vcmask 736256  }
  0x39   : > { %464 = vrot.lane.b32.xlu1 %v770_v6, %s958_s7  ;;  %v240_v29 = vld [vmem:[%s1073_s30] ss:$4 sm:$0xf]  ;;  %v769_v42 = vld [vmem:[%s1073_s30 + $0x3] ss:$4 sm:$0x7] }
  0x3a   : > { %448 = vrot.lane.b32.xlu0 %v768_v7, %s957_s6  ;;  %v251_v30 = vld [vmem:[%s1073_s30] ss:$4 sm:$0xf]  ;;  %459 = vst.msk [vmem:[#allocation2 + $0x4b] ss:$8 sm:$0x7] %vm1143_vm1, %v769_v42 }
  0x3b   : > { %474 = vrot.lane.b32.xlu2 %v771_v8, %s959_s8  ;;  %v262_v31 = vld [vmem:[%s1073_s30] ss:$4 sm:$0xf]  ;;  %v760_v61 = vld [vmem:[%s1073_s30 + $0x2] ss:$4 sm:$0x7] }
  0x3c   : > { %373 = vst.msk [vmem:[#allocation2 + $0x32] ss:$8 sm:$0x7] %vm1143_vm1, %v760_v61  ;;  %vm201_vm6 = vcmask 1039360   ;;  %vm568_vm7 = vcmask 1043456   ;;  %vm234_vm8 = vcmask 891904  }
  0x3d   : > { %vm223_vm9 = vcmask 900096   ;;  %vm564_vm10 = vcmask 293888   ;;  %s791_s22 = smul.u32 24, %s1069_s26 }
  0x3e   : > { %s792_s27 = smul.u32 24, %s1004_s16 }
  0x41   : > { %494 = vrot.lane.b32.xlu1 %v773_v9, %s960_s9 }
  0x42   : > { %484 = vrot.lane.b32.xlu0 %v772_v10, %s961_s10 }
  0x43   : > { %352 = vrot.lane.b32.xlu2 %v758_v11, %s954_s4 }
  0x49   : > { %378 = vrot.lane.b32.xlu1 %v761_v12, %s958_s7 }
  0x4a   : > { %362 = vrot.lane.b32.xlu0 %v759_v13, %s957_s6 }
  0x4b   : > { %388 = vrot.lane.b32.xlu2 %v762_v14, %s959_s8 }
  0x51   : > { %408 = vrot.lane.b32.xlu1 %v764_v15, %s960_s9 }
  0x52   : > { %398 = vrot.lane.b32.xlu0 %v763_v16, %s961_s10 }
  0x53   : > { %418 = vrot.lane.b32.xlu2 %v765_v17, %s955_s5 }
  0x59   : > { %292 = vrot.lane.b32.xlu1 %v752_v18, %s958_s7 }
  0x5a   : > { %275 = vrot.lane.b32.xlu0 %v273_v19, %s957_s6 }
  0x5b   : > { %302 = vrot.lane.b32.xlu2 %v753_v20, %s959_s8 }
  0x61   : > { %322 = vrot.lane.b32.xlu1 %v755_v21, %s960_s9 }
  0x62   : > { %312 = vrot.lane.b32.xlu0 %v754_v22, %s961_s10 }
  0x63   : > { %332 = vrot.lane.b32.xlu2 %v756_v23, %s955_s5 }
  0x69   : > { %198 = vrot.lane.b32.xlu1 %v196_v25, %s958_s7 }
  0x6a   : > { %342 = vrot.lane.b32.xlu0 %v757_v24, %s956_s23 }
  0x6b   : > { %209 = vrot.lane.b32.xlu2 %v207_v26, %s959_s8 }
  0x71   : > { %231 = vrot.lane.b32.xlu1 %v229_v28, %s960_s9 }
  0x72   : > { %220 = vrot.lane.b32.xlu0 %v218_v27, %s961_s10  ;;  %s906_s10 = scalar_lea.hbm %s1298_s3, 48 }
  0x73   : > { %242 = vrot.lane.b32.xlu2 %v240_v29, %s955_s5 }
  0x79   : > { %264 = vrot.lane.b32.xlu1 %v262_v31, %s954_s4  ;;  %v751_v31 = vld [vmem:[%s1073_s30 + $0x1] ss:$4 sm:$0x7]  ;;  %s188_s4 = scalar_lea.vmem [#allocation6], %s791_s22 }
  0x7a   : > { %253 = vrot.lane.b32.xlu0 %v251_v30, %s956_s23  ;;  %287 = vst.msk [vmem:[#allocation2 + $0x19] ss:$8 sm:$0x7] %vm1143_vm1, %v751_v31  ;;  %s670_s5 = sshll.u32 %s188_s4, 4  ;;  %s657_s23 = scalar_lea.sflag [#allocation5], %s1069_s26  ;;  %s671_s5 = int_to_ptr.vmem [resolvable:$true] %s670_s5 }
  0x85   : > { %v429_v33 = vpop.permute.xlu2 %428 }
  0x86   : > { %v430_v34 = vrot.slane %v429_v33, 1 }
  0x88   : > { %v431_v36 = vsel %vm256_vm0, %v429_v33, %v430_v34 }
  0x89   : > { %434 = vst.msk [vmem:[#allocation2 + $0x48] ss:$8 sm:$0x7] %vm1143_vm1, %v431_v36 }
  0x8d   : > { %v439_v37 = vpop.permute.xlu2 %438 }
  0x8e   : > { %v440_v38 = vrot.slane %v439_v37, 1 }
  0x90   : > { %v441_v39 = vsel %vm267_vm2, %v439_v37, %v440_v38 }
  0x91   : > { %444 = vst.msk [vmem:[#allocation2 + $0x49] ss:$8 sm:$0x7] %vm1143_vm1, %v441_v39 }
  0x95   : > { %v475_v40 = vpop.permute.xlu2 %474 }
  0x96   : > { %v476_v41 = vrot.slane %v475_v40, 1 }
  0x98   : > { %v477_v43 = vsel %vm212_vm3, %v475_v40, %v476_v41 }
  0x99   : > { %480 = vst.msk [vmem:[#allocation2 + $0x4d] ss:$8 sm:$0x7] %vm1143_vm1, %v477_v43 }
  0x9b   : > { %v525_v44 = vpop.permute.xlu1 %524 }
  0x9c   : > { %v505_v45 = vpop.permute.xlu0 %504  ;;  %v526_v46 = vrot.slane %v525_v44, 1 }
  0x9d   : > { %v506_v47 = vrot.slane %v505_v45, 1  ;;  %v353_v50 = vpop.permute.xlu2 %352 }
  0x9e   : > { %v527_v48 = vsel %vm267_vm2, %v525_v44, %v526_v46  ;;  %v354_v51 = vrot.slane %v353_v50, 1 }
  0x9f   : > { %v507_v49 = vsel %vm245_vm4, %v505_v45, %v506_v47  ;;  %530 = vst.msk [vmem:[#allocation2 + $0x62] ss:$8 sm:$0x7] %vm1143_vm1, %v527_v48 }
  0xa0   : > { %510 = vst.msk [vmem:[#allocation2 + $0x60] ss:$8 sm:$0x7] %vm1143_vm1, %v507_v49  ;;  %v355_v52 = vsel %vm267_vm2, %v353_v50, %v354_v51 }
  0xa1   : > { %358 = vst.msk [vmem:[#allocation2 + $0x30] ss:$8 sm:$0x7] %vm1143_vm1, %v355_v52 }
  0xa3   : > { %v535_v53 = vpop.permute.xlu1 %534 }
  0xa4   : > { %v515_v54 = vpop.permute.xlu0 %514  ;;  %v536_v55 = vrot.slane %v535_v53, 1 }
  0xa5   : > { %v516_v56 = vrot.slane %v515_v54, 1  ;;  %v389_v59 = vpop.permute.xlu2 %388 }
  0xa6   : > { %v537_v57 = vsel %vm278_vm5, %v535_v53, %v536_v55  ;;  %v390_v60 = vrot.slane %v389_v59, 1 }
  0xa7   : > { %v517_v58 = vsel %vm256_vm0, %v515_v54, %v516_v56  ;;  %540 = vst.msk [vmem:[#allocation2 + $0x63] ss:$8 sm:$0x7] %vm1143_vm1, %v537_v57  ;;  %v189_v54 = vld [vmem:[%s1073_s30] ss:$4 sm:$0x7]  ;;  %s668_s30 = scalar_lea.hbm %s1298_s3, %s792_s27 }
  0xa8   : > { %520 = vst.msk [vmem:[#allocation2 + $0x61] ss:$8 sm:$0x7] %vm1143_vm1, %v517_v58  ;;  %v391_v62 = vsel %vm212_vm3, %v389_v59, %v390_v60  ;;  %s672_s16 = sshll.u32 %s668_s30, 4  ;;  %s673_s16 = int_to_ptr.hbm [resolvable:$true] %s672_s16 }
  0xa9   : > { %394 = vst.msk [vmem:[#allocation2 + $0x34] ss:$8 sm:$0x7] %vm1143_vm1, %v391_v62  ;;  %v558_v62 = vld [vmem:[%s1297_s2] sm:$0xff]  ;;  %s900_s6 = sshra.s32 %s673_s16, 4  ;;  %s901_s6 = int_to_ptr.hbm [resolvable:$true] %s900_s6 }
  0xaa   : > { %194 = vst.msk [vmem:[#allocation2] ss:$8 sm:$0x7] %vm1143_vm1, %v189_v54  ;;  %s902_s7 = scalar_lea.hbm %s901_s6, 24  ;;  %p907_p0 = scmp.lt.s32.totalorder %s901_s6, %s1298_s3 }
  0xab   : > { %v465_v63 = vpop.permute.xlu1 %464  ;;  %p903_p6 = scmp.ne.s32.totalorder %s901_s6, %s902_s7  ;;  %p908_p1 = scmp.lt.s32.totalorder %s906_s10, %s902_s7 }
  0xac   : > { %v449_v0 = vpop.permute.xlu0 %448  ;;  %v466_v1 = vrot.slane %v465_v63, 1 }
  0xad   : > { %v450_v2 = vrot.slane %v449_v0, 1  ;;  %v419_v6 = vpop.permute.xlu2 %418  ;;  %p904_p9 = pnand %p903_p6, %p1033_p11  ;;  %p909_p3 = por %p908_p1, %p907_p0 }
  0xae   : > { %v467_v3 = vsel %vm201_vm6, %v465_v63, %v466_v1  ;;  %v420_v8 = vrot.slane %v419_v6, 1  ;;  %v962_v1 = vmov 0  }
  0xaf   : > { %v451_v4 = vsel %vm278_vm5, %v449_v0, %v450_v2  ;;  %470 = vst.msk [vmem:[#allocation2 + $0x4c] ss:$8 sm:$0x7] %vm1143_vm1, %v467_v3  ;;  %v555_v5 = vld [vmem:[#allocation2 + $0x60] sm:$0xf]  ;;  %848 = vset.pattern.permute.xlu2 %v962_v1  ;;  %849 = vset.pattern.permute.xlu0 %v962_v1  ;;  %p905_p13 = pneg %p904_p9 }
  0xb0   : > { %454 = vst.msk [vmem:[#allocation2 + $0x4a] ss:$8 sm:$0x7] %vm1143_vm1, %v451_v4  ;;  %778 = vmatpush.msk.msra.mxu0 %vm568_vm7, %v555_v5  ;;  %v556_v7 = vld [vmem:[#allocation2 + $0x68] sm:$0xf]  ;;  %v421_v10 = vsel %vm245_vm4, %v419_v6, %v420_v8  ;;  %561 = vperm.xlu2 %848, %v558_v62  }
  0xb1   : > { %780 = vmatpush.msk.msra.mxu1 %vm568_vm7, %v556_v7  ;;  %v557_v9 = vld [vmem:[#allocation2 + $0x70] sm:$0xf]  ;;  %424 = vst.msk [vmem:[#allocation2 + $0x37] ss:$8 sm:$0x7] %vm1143_vm1, %v421_v10  ;;  %p910_p4 = pnand %p909_p3, %p905_p13 }
  0xb2   : > { %782 = vmatpush.msk.msra.mxu2 %vm568_vm7, %v557_v9 }
  0xb3   : > { %v495_v11 = vpop.permute.xlu1 %494 }
  0xb4   : > { %v485_v12 = vpop.permute.xlu0 %484  ;;  %v496_v13 = vrot.slane %v495_v11, 1 }
  0xb5   : > { %v486_v14 = vrot.slane %v485_v12, 1  ;;  %v303_v17 = vpop.permute.xlu2 %302 }
  0xb6   : > { %v497_v15 = vsel %vm234_vm8, %v495_v11, %v496_v13  ;;  %v304_v18 = vrot.slane %v303_v17, 1 }
  0xb7   : > { %v487_v16 = vsel %vm223_vm9, %v485_v12, %v486_v14  ;;  %500 = vst.msk [vmem:[#allocation2 + $0x4f] ss:$8 sm:$0x7] %vm1143_vm1, %v497_v15 }
  0xb8   : > { %490 = vst.msk [vmem:[#allocation2 + $0x4e] ss:$8 sm:$0x7] %vm1143_vm1, %v487_v16  ;;  %v305_v19 = vsel %vm212_vm3, %v303_v17, %v304_v18 }
  0xb9   : > { %308 = vst.msk [vmem:[#allocation2 + $0x1b] ss:$8 sm:$0x7] %vm1143_vm1, %v305_v19 }
  0xbb   : > { %v379_v20 = vpop.permute.xlu1 %378 }
  0xbc   : > { %v363_v21 = vpop.permute.xlu0 %362  ;;  %v380_v22 = vrot.slane %v379_v20, 1 }
  0xbd   : > { %v364_v23 = vrot.slane %v363_v21, 1  ;;  %v333_v29 = vpop.permute.xlu2 %332 }
  0xbe   : > { %v381_v24 = vsel %vm201_vm6, %v379_v20, %v380_v22  ;;  %v334_v30 = vrot.slane %v333_v29, 1 }
  0xbf   : > { %v365_v25 = vsel %vm278_vm5, %v363_v21, %v364_v23  ;;  %384 = vst.msk [vmem:[#allocation2 + $0x33] ss:$8 sm:$0x7] %vm1143_vm1, %v381_v24  ;;  %v552_v26 = vld [vmem:[#allocation2 + $0x48] sm:$0xff]  ;;  %v553_v27 = vld [vmem:[#allocation2 + $0x50] sm:$0xff]  ;;  %v554_v28 = vld [vmem:[#allocation2 + $0x58] sm:$0xff] }
  0xc0   : > { %368 = vst.msk [vmem:[#allocation2 + $0x31] ss:$8 sm:$0x7] %vm1143_vm1, %v365_v25  ;;  %590 = vmatpush.msra.mxu0 %v552_v26  ;;  %610 = vmatpush.msra.mxu1 %v553_v27  ;;  %v335_v32 = vsel %vm245_vm4, %v333_v29, %v334_v30  ;;  %v542_v21 = vld [vmem:[%s1296_s1] sm:$0xff] }
  0xc1   : > { %630 = vmatpush.msra.mxu2 %v554_v28  ;;  %338 = vst.msk [vmem:[#allocation2 + $0x1e] ss:$8 sm:$0x7] %vm1143_vm1, %v335_v32 }
  0xc3   : > { %v409_v33 = vpop.permute.xlu1 %408 }
  0xc4   : > { %v399_v34 = vpop.permute.xlu0 %398  ;;  %v410_v36 = vrot.slane %v409_v33, 1 }
  0xc5   : > { %v400_v37 = vrot.slane %v399_v34, 1  ;;  %v210_v40 = vpop.permute.xlu2 %209 }
  0xc6   : > { %v411_v38 = vsel %vm234_vm8, %v409_v33, %v410_v36  ;;  %v211_v41 = vrot.slane %v210_v40, 1 }
  0xc7   : > { %v401_v39 = vsel %vm223_vm9, %v399_v34, %v400_v37  ;;  %414 = vst.msk [vmem:[#allocation2 + $0x36] ss:$8 sm:$0x7] %vm1143_vm1, %v411_v38 }
  0xc8   : > { %404 = vst.msk [vmem:[#allocation2 + $0x35] ss:$8 sm:$0x7] %vm1143_vm1, %v401_v39  ;;  %v213_v42 = vsel %vm212_vm3, %v210_v40, %v211_v41 }
  0xc9   : > { %216 = vst.msk [vmem:[#allocation2 + $0x2] ss:$8 sm:$0x7] %vm1143_vm1, %v213_v42 }
  0xcb   : > { %v293_v43 = vpop.permute.xlu1 %292 }
  0xcc   : > { %v276_v44 = vpop.permute.xlu0 %275  ;;  %v294_v45 = vrot.slane %v293_v43, 1 }
  0xcd   : > { %v277_v46 = vrot.slane %v276_v44, 1  ;;  %v243_v52 = vpop.permute.xlu2 %242 }
  0xce   : > { %v295_v47 = vsel %vm201_vm6, %v293_v43, %v294_v45  ;;  %v244_v53 = vrot.slane %v243_v52, 1 }
  0xcf   : > { %v279_v48 = vsel %vm278_vm5, %v276_v44, %v277_v46  ;;  %298 = vst.msk [vmem:[#allocation2 + $0x1a] ss:$8 sm:$0x7] %vm1143_vm1, %v295_v47  ;;  %v549_v49 = vld [vmem:[#allocation2 + $0x30] sm:$0xff]  ;;  %v550_v50 = vld [vmem:[#allocation2 + $0x38] sm:$0xff]  ;;  %v551_v51 = vld [vmem:[#allocation2 + $0x40] sm:$0xff] }
  0xd0   : > { %282 = vst.msk [vmem:[#allocation2 + $0x18] ss:$8 sm:$0x7] %vm1143_vm1, %v279_v48  ;;  %591 = vmatpush.msra.mxu0 %v549_v49  ;;  %611 = vmatpush.msra.mxu1 %v550_v50  ;;  %v246_v55 = vsel %vm245_vm4, %v243_v52, %v244_v53 }
  0xd1   : > { %631 = vmatpush.msra.mxu2 %v551_v51  ;;  %249 = vst.msk [vmem:[#allocation2 + $0x5] ss:$8 sm:$0x7] %vm1143_vm1, %v246_v55 }
  0xd3   : > { %v323_v56 = vpop.permute.xlu1 %322 }
  0xd4   : > { %v313_v57 = vpop.permute.xlu0 %312  ;;  %v324_v58 = vrot.slane %v323_v56, 1 }
  0xd5   : > { %v314_v59 = vrot.slane %v313_v57, 1 }
  0xd6   : > { %v325_v60 = vsel %vm234_vm8, %v323_v56, %v324_v58 }
  0xd7   : > { %v315_v61 = vsel %vm223_vm9, %v313_v57, %v314_v59  ;;  %328 = vst.msk [vmem:[#allocation2 + $0x1d] ss:$8 sm:$0x7] %vm1143_vm1, %v325_v60 }
  0xd8   : > { %318 = vst.msk [vmem:[#allocation2 + $0x1c] ss:$8 sm:$0x7] %vm1143_vm1, %v315_v61 }
  0xdb   : > { %v199_v0 = vpop.permute.xlu1 %198 }
  0xdc   : > { %v343_v63 = vpop.permute.xlu0 %342  ;;  %v200_v3 = vrot.slane %v199_v0, 1 }
  0xdd   : > { %v344_v2 = vrot.slane %v343_v63, 1 }
  0xde   : > { %v202_v5 = vsel %vm201_vm6, %v199_v0, %v200_v3 }
  0xdf   : > { %v345_v4 = vsel %vm256_vm0, %v343_v63, %v344_v2  ;;  %205 = vst.msk [vmem:[#allocation2 + $0x1] ss:$8 sm:$0x7] %vm1143_vm1, %v202_v5 }
  0xe0   : > { %348 = vst.msk [vmem:[#allocation2 + $0x1f] ss:$8 sm:$0x7] %vm1143_vm1, %v345_v4 }
  0xe3   : > { %v232_v7 = vpop.permute.xlu1 %231 }
  0xe4   : > { %v221_v6 = vpop.permute.xlu0 %220  ;;  %v233_v9 = vrot.slane %v232_v7, 1 }
  0xe5   : > { %v222_v8 = vrot.slane %v221_v6, 1 }
  0xe6   : > { %v235_v11 = vsel %vm234_vm8, %v232_v7, %v233_v9 }
  0xe7   : > { %v224_v10 = vsel %vm223_vm9, %v221_v6, %v222_v8  ;;  %v546_v12 = vld [vmem:[#allocation2 + $0x18] sm:$0xff]  ;;  %v547_v13 = vld [vmem:[#allocation2 + $0x20] sm:$0xff]  ;;  %v548_v14 = vld [vmem:[#allocation2 + $0x28] sm:$0xff]  ;;  %238 = vst.msk [vmem:[#allocation2 + $0x4] ss:$8 sm:$0x7] %vm1143_vm1, %v235_v11 }
  0xe8   : > { %227 = vst.msk [vmem:[#allocation2 + $0x3] ss:$8 sm:$0x7] %vm1143_vm1, %v224_v10  ;;  %592 = vmatpush.msra.mxu0 %v546_v12  ;;  %612 = vmatpush.msra.mxu1 %v547_v13 }
  0xe9   : > { %632 = vmatpush.msra.mxu2 %v548_v14 }
  0xeb   : > { %v265_v16 = vpop.permute.xlu1 %264 }
  0xec   : > { %v254_v15 = vpop.permute.xlu0 %253  ;;  %v266_v18 = vrot.slane %v265_v16, 1 }
  0xed   : > { %v255_v17 = vrot.slane %v254_v15, 1 }
  0xee   : > { %v268_v20 = vsel %vm267_vm2, %v265_v16, %v266_v18 }
  0xef   : > { %v257_v19 = vsel %vm256_vm0, %v254_v15, %v255_v17  ;;  %271 = vst.msk [vmem:[#allocation2 + $0x7] ss:$8 sm:$0x7] %vm1143_vm1, %v268_v20 }
  0xf0   : > { %260 = vst.msk [vmem:[#allocation2 + $0x6] ss:$8 sm:$0x7] %vm1143_vm1, %v257_v19 }
  0xf7   : > { %v543_v22 = vld [vmem:[#allocation2] sm:$0xff]  ;;  %v544_v23 = vld [vmem:[#allocation2 + $0x8] sm:$0xff]  ;;  %v545_v24 = vld [vmem:[#allocation2 + $0x10] sm:$0xff] }
  0xf8   : > { %593 = vmatpush.msra.mxu0 %v543_v22  ;;  %613 = vmatpush.msra.mxu1 %v544_v23 }
  0xf9   : > { %633 = vmatpush.msra.mxu2 %v545_v24  ;;  %779 = vmatmul.msk.f32.vlgmr.msra.gmra.mxu0 %vm564_vm10, %v542_v21 }
  0xfa   : > { %781 = vmatmul.msk.f32.vlgmr.msra.gmra.mxu1 %vm564_vm10, %v542_v21  ;;  %783 = vmatmul.msk.f32.vlgmr.msra.gmra.mxu2 %vm564_vm10, %v542_v21 }
 0x10a   : > { %v562_v25 = vpop.permute.xlu2 %561 }
 0x176   : > { %v595_v26 = vpop.f32.mrf.mxu0 }
 0x177   : > { %v596_v35 = vadd.f32 %v595_v26, %v562_v25  ;;  %v615_v27 = vpop.f32.mrf.mxu1 }
 0x178   : > { %v616_v28 = vadd.f32 %v615_v27, %v562_v25 }
 0x179   : > { %v641_v29 = vmul.f32 1.442695, %v596_v35  ;;  %vm638_vm11 = vcmp.gt.f32.partialorder %v596_v35, 0.0 }
 0x17a   : > { %v643_v30 = vmul.f32 1.442695, %v616_v28  ;;  %vm639_vm12 = vcmp.gt.f32.partialorder %v616_v28, 0.0 }
 0x17b   : > { %850 = vpow2.f32 %v641_v29 }
 0x17c   : > { %852 = vpow2.f32 %v643_v30 }
 0x17d   : > { %v635_v31 = vpop.f32.mrf.mxu2 }
 0x17e   : > { %v636_v32 = vadd.f32 %v635_v31, %v562_v25 }
 0x180   : > { %v645_v33 = vmul.f32 1.442695, %v636_v32  ;;  %vm640_vm13 = vcmp.gt.f32.partialorder %v636_v32, 0.0 }
 0x181   : > { %v851_v34 = vpop.eup %850 }
 0x182   : > { %v853_v36 = vpop.eup %852  ;;  %v784_v37 = vadd.f32 -1.0, %v851_v34  ;;  %854 = vpow2.f32 %v645_v33 }
 0x183   : > { %v785_v38 = vadd.f32 -1.0, %v853_v36 }
 0x184   : > { %v650_v39 = vsel %vm638_vm11, %v596_v35, %v784_v37 }
 0x185   : > { %653 = vst [vmem:[%s188_s4] sm:$0xff] %v650_v39  ;;  %v651_v40 = vsel %vm639_vm12, %v616_v28, %v785_v38 }
 0x186   : > { %654 = vst [vmem:[%s188_s4 + $0x8] sm:$0xff] %v651_v40 }
 0x188   : > { %v855_v41 = vpop.eup %854 }
 0x189   : > { %v786_v42 = vadd.f32 -1.0, %v855_v41 }
 0x18b   : > { %v652_v43 = vsel %vm640_vm13, %v636_v32, %v786_v42 }
 0x18c   : > { %655 = vst [vmem:[%s188_s4 + $0x10] sm:$0xff] %v652_v43 }
 0x18d   : > { %913 = shalt.err (!%p910_p4)
}
 0x18e   : > { %795 = dma.vmem_to_hbm [thread:$0]  (%p1033_p11), %s671_s5, 384, %s673_s16, %s657_s23  }
 0x18f PF: > { %s684_s26 = sand.u32 1, %s940_s12   ;;  %p1306_p7 = scmp.ge.s32.totalorder %s952_s15, 2 }
 0x190   : > { %s685_s19 = scalar_lea.sflag [#allocation5], %s684_s26 }
 0x191   : > { %p802_p5 = pnand %p1306_p7, %p1037_p12 }
 0x193   : > { %p803_p8 = pneg %p802_p5 }
 0x195   : > { %935 = dma.done.wait (%p803_p8), %s685_s19, 384  }
 0x196   : > { %937 = vsyncadd (%p803_p8), %s685_s19, 4294966912  ;;  %p16_p10 = scmp.ge.s32.totalorder %s1008_s18, 4   ;;  %s1307_s12 = smov %s944_s13 }
 0x197   : > { %s1308_s13 = smov %s948_s14  ;;  %s1309_s14 = smov %s1020_s21 }
 0x198   : > { %s1310_s15 = smov %s1008_s18  ;;  %18 = sbr.rel (!%p16_p10) target bundleno = 5 (0x5), region = 118 }
 0x19d   :  { %691 = vsyncpa [#allocation4], 1 }
 0x19e   :  { %693 = vsyncpa [#allocation4 + $0x1], 1 }
 0x19f   :  { %694 = vsyncpa [#allocation5], 1 }
 0x1a0   :  { %696 = vsyncpa [#allocation5 + $0x1], 1 }

</bundles_post_ra>
